<compile_context>
chip_gen: v7x
topology: tpu7x:2x2x1
jax: 0.10.0
libtpu: 0.0.40
codegen_flags: <defaults>
</compile_context>

<pallas_src>
import jax
import jax.numpy as jnp
from jax.experimental import pallas as pl
from jax.experimental.pallas import tpu as pltpu


def cluster_pooling(seg_onehot, node_feats, cluster, *, tn_target=1024):
    """seg_onehot: [B, N], node_feats: [N, D] (any float dtype), cluster: [N, 1] or [N].

    Returns pooled / sum(cluster), shape [B, D], float32.
    """
    B, N = seg_onehot.shape
    N2, D = node_feats.shape
    assert N2 == N

    x = node_feats                              # native dtype, never copied or padded
    itemsize = jnp.dtype(x.dtype).itemsize

    # Fold the 0/1 cluster mask into the tiny segment matrix (B x N elementwise,
    # exact) and match x's dtype so the MXU sees narrow operands when x is bf16.
    c_row = cluster.astype(jnp.float32).reshape(1, N)
    segw = (seg_onehot.astype(jnp.float32) * c_row).astype(x.dtype)

    # Global denominator (same precondition as the PyTorch module: sum != 0).
    denom = jnp.sum(c_row)

    # ---- node-axis tiling ---------------------------------------------------
    # Largest 128-aligned tile such that a double-buffered x tile stays under
    # ~16 MiB (half the 32 MiB scoped VMEM we request), capped at tn_target.
    # 1024 rows reaches ~86% of the HBM roofline on v6e and amortizes the
    # ~0.35 us/grid-step overhead on v7x's 3.2 TB/s HBM.
    x_tile_budget = 16 * 1024 * 1024
    tn_fit = max(128, (x_tile_budget // (2 * D * itemsize)) // 128 * 128)
    tn_cap = max(128, (min(tn_target, tn_fit) // 128) * 128)
    if N <= tn_cap:
        tn = N                                  # single block == full dim (always legal)
    else:
        tn = tn_cap                             # multiple of 128 (lane dim of segw)
    nblocks = pl.cdiv(N, tn)

    # Split the N reduction over a leading "parallel" axis so both v7x
    # TensorCores get work; on single-core chips it just yields 2 partials.
    S = 2 if nblocks >= 2 else 1
    nk = pl.cdiv(nblocks, S)
    n_cols = S * nk * tn                        # padded segw width (cheap: B rows)
    segw = jnp.pad(segw, ((0, 0), (0, n_cols - N)))

    # TODO(synk): for enormous D (one x row block > ~8 MiB) fall back to tiling
    # D with a VMEM-resident segw instead of shrinking tn below one MXU pass.

    def kernel(segw_ref, x_ref, o_ref):
        p = pl.program_id(0)
        k = pl.program_id(1)

        @pl.when(k == 0)
        def _init():
            o_ref[...] = jnp.zeros_like(o_ref)

        def accumulate(x_tile):
            o_ref[0] += jnp.dot(segw_ref[...], x_tile,
                                preferred_element_type=jnp.float32)

        if N % tn == 0:
            # No ragged tail can ever occur: single fast path.
            accumulate(x_ref[...])
        else:
            # Effective x block index (clamped; slots past the last real tile
            # re-read the last tile but see all-zero segw columns).
            blk = jnp.minimum(p * nk + k, nblocks - 1)
            row_start = blk * tn

            @pl.when(row_start + tn <= N)       # full tile: fast path
            def _full():
                accumulate(x_ref[...])

            @pl.when(row_start + tn > N)        # ragged tail: zero garbage rows
            def _tail():
                rows = jax.lax.broadcasted_iota(jnp.int32, (tn, 1), 0) + row_start
                xv = x_ref[...]
                accumulate(jnp.where(rows < N, xv, jnp.zeros_like(xv)))

    parts = pl.pallas_call(
        kernel,
        out_shape=jax.ShapeDtypeStruct((S, B, D), jnp.float32),
        grid_spec=pltpu.PrefetchScalarGridSpec(
            num_scalar_prefetch=0,
            grid=(S, nk),                       # reduction (node) axis last
            in_specs=[
                # segw: one (B, tn) column block per step (padded to n_cols so
                # out-of-range slots read zero columns; never clamped).
                pl.BlockSpec((B, tn), lambda p, k: (0, p * nk + k)),
                # x: full feature width per block -> contiguous row DMAs, read
                # exactly once, native dtype, no wrapper pad.
                pl.BlockSpec((tn, D),
                             lambda p, k: (jnp.minimum(p * nk + k, nblocks - 1), 0)),
            ],
            # One lane-dense [B, D] f32 partial per split, resident across k
            # (accumulated in place -> no scratch accumulator needed).
            out_specs=pl.BlockSpec((1, B, D), lambda p, k: (p, 0, 0)),
        ),
        compiler_params=pltpu.CompilerParams(
            dimension_semantics=("parallel", "arbitrary"),
            vmem_limit_bytes=32 * 1024 * 1024,
        ),
        cost_estimate=pl.CostEstimate(
            flops=2 * B * N * D,
            transcendentals=0,
            bytes_accessed=(N * D * itemsize        # x streamed exactly once
                            + B * n_cols * itemsize  # segw (incl. cheap padding)
                            + S * B * D * 4),        # partial outputs
        ),
    )(segw, x)

    # Tiny epilogue on [S, B, D]: combine per-core partials, apply the global
    # 1/sum(cluster).  (inf/NaN if the mask is all-zero, matching PyTorch.)
    return parts.sum(axis=0) / denom


def _reference(seg_onehot, node_feats, cluster):
    x = node_feats.astype(jnp.float32)
    c = cluster.astype(jnp.float32).reshape(-1, 1)
    pooled = jnp.einsum("bn,nd->bd", seg_onehot.astype(jnp.float32), x * c,
                        precision=jax.lax.Precision.HIGHEST)
    return pooled / jnp.sum(c)


if __name__ == "__main__":
    key = jax.random.PRNGKey(0)
    k1, k2, k3 = jax.random.split(key, 3)

    # --- test 1: tiny shapes, single tile, native-f32 features ---------------
    B, n_per, D = 2, 8, 32
    N = B * n_per
    node_feats = jax.random.normal(k1, (N, D), dtype=jnp.float32)
    cluster = jax.random.bernoulli(k2, 0.5, (N, 1)).astype(jnp.float32)
    cluster = cluster.at[0, 0].set(1.0)                 # nonzero denominator
    graph_ids = jnp.repeat(jnp.arange(B), n_per)
    seg_onehot = jax.nn.one_hot(graph_ids, B, dtype=jnp.float32).T

    out = jax.block_until_ready(cluster_pooling(seg_onehot, node_feats, cluster))
    ref = _reference(seg_onehot, node_feats, cluster)
    assert out.shape == (B, D)
    # Loose-ish tolerance: MXU matmuls may use bf16 passes for f32 operands.
    assert jnp.allclose(out, ref, atol=2e-2, rtol=2e-2)

    # --- test 2: ragged N, multi-tile grid, 2-way core split, bf16 features --
    B2, D2, N2 = 2, 32, 300                # 300 = 2*128 + 44 -> partial tail tile
    node_feats2 = jax.random.normal(k3, (N2, D2), dtype=jnp.float32).astype(jnp.bfloat16)
    cluster2 = jax.random.bernoulli(k2, 0.5, (N2, 1)).astype(jnp.float32)
    cluster2 = cluster2.at[0, 0].set(1.0)
    gids2 = (jnp.arange(N2) >= 150).astype(jnp.int32)   # 2 ragged graphs
    seg2 = jax.nn.one_hot(gids2, B2, dtype=jnp.float32).T

    out2 = jax.block_until_ready(
        cluster_pooling(seg2, node_feats2, cluster2, tn_target=128))
    ref2 = _reference(seg2, node_feats2, cluster2)
    assert out2.shape == (B2, D2)
    assert jnp.allclose(out2, ref2, atol=2e-2, rtol=2e-2)

    print("KERNEL_OK")
</pallas_src>

<mosaic_0001>
module attributes {stable_mosaic.version = 11 : i64} {
  func.func @kernel(%arg0: i32, %arg1: i32, %arg2: memref<2x16xf32, #tpu.memory_space<vmem>>, %arg3: memref<16x32xf32, #tpu.memory_space<vmem>>, %arg4: memref<1x2x32xf32, #tpu.memory_space<vmem>>) attributes {dimension_semantics = [#tpu.dimension_semantics<parallel>, #tpu.dimension_semantics<arbitrary>], iteration_bounds = array<i64: 1, 1>, scalar_prefetch = 0 : i64, scratch_operands = 0 : i64, tpu.core_type = #tpu.core_type<tc>, window_params = [{transform_indices = @transform_0, window_bounds = array<i64: 2, 16>}, {transform_indices = @transform_1, window_bounds = array<i64: 16, 32>}, {transform_indices = @transform_2, window_bounds = array<i64: 1, 2, 32>}]} {
    %c0_i32 = arith.constant 0 : i32
    %0 = arith.cmpi eq, %arg1, %c0_i32 : i32
    %1 = arith.extui %0 : i1 to i32
    %c0_i32_0 = arith.constant 0 : i32
    %2 = arith.cmpi ne, %1, %c0_i32_0 : i32
    scf.if %2 {
      %cst_10 = arith.constant 0.000000e+00 : f32
      %12 = vector.broadcast %cst_10 : f32 to vector<1x2x32xf32>
      %c0_11 = arith.constant 0 : index
      %c0_12 = arith.constant 0 : index
      %c0_13 = arith.constant 0 : index
      %13 = vector.load %arg4[%c0_11, %c0_12, %c0_13] : memref<1x2x32xf32, #tpu.memory_space<vmem>>, vector<1x2x32xf32>
      tpu.vector_store %arg4[%c0_11, %c0_12, %c0_13], %12 {strides = array<i32>} : memref<1x2x32xf32, #tpu.memory_space<vmem>>, vector<1x2x32xf32>,
    } else {
    }
    %c0 = arith.constant 0 : index
    %c0_1 = arith.constant 0 : index
    %3 = vector.load %arg3[%c0, %c0_1] : memref<16x32xf32, #tpu.memory_space<vmem>>, vector<16x32xf32>
    %c0_2 = arith.constant 0 : index
    %c0_3 = arith.constant 0 : index
    %c0_4 = arith.constant 0 : index
    %4 = vector.load %arg4[%c0_2, %c0_3, %c0_4] : memref<1x2x32xf32, #tpu.memory_space<vmem>>, vector<1x2x32xf32>
    %5 = vector.shape_cast %4 : vector<1x2x32xf32> to vector<2x32xf32>
    %c0_5 = arith.constant 0 : index
    %c0_6 = arith.constant 0 : index
    %6 = vector.load %arg2[%c0_5, %c0_6] : memref<2x16xf32, #tpu.memory_space<vmem>>, vector<2x16xf32>
    %cst = arith.constant dense<0.000000e+00> : vector<2x32xf32>
    %7 = tpu.matmul %6, %3, %cst {dimension_numbers = #tpu.dot_dimension_numbers<[1], [0], [0], [1], [0, 0, 1, 1], [], []>} : vector<2x16xf32>, vector<16x32xf32>, vector<2x32xf32> -> vector<2x32xf32>
    %8 = arith.addf %5, %7 : vector<2x32xf32>
    %c0_7 = arith.constant 0 : index
    %c0_8 = arith.constant 0 : index
    %c0_9 = arith.constant 0 : index
    %9 = vector.load %arg4[%c0_7, %c0_8, %c0_9] : memref<1x2x32xf32, #tpu.memory_space<vmem>>, vector<1x2x32xf32>
    %10 = vector.shape_cast %9 : vector<1x2x32xf32> to vector<2x32xf32>
    %11 = vector.shape_cast %8 : vector<2x32xf32> to vector<1x2x32xf32>
    tpu.vector_store %arg4[%c0_7, %c0_8, %c0_9], %11 {strides = array<i32>} : memref<1x2x32xf32, #tpu.memory_space<vmem>>, vector<1x2x32xf32>,
    return
  }
  func.func @transform_0(%arg0: i32, %arg1: i32) -> (i32, i32) {
    %c1_i32 = arith.constant 1 : i32
    %0 = arith.muli %arg0, %c1_i32 : i32
    %1 = arith.addi %0, %arg1 : i32
    %c0_i32 = arith.constant 0 : i32
    %c0_i32_0 = arith.constant 0 : i32
    return %c0_i32, %1 : i32, i32
  }
  func.func @transform_1(%arg0: i32, %arg1: i32) -> (i32, i32) {
    %c1_i32 = arith.constant 1 : i32
    %0 = arith.muli %arg0, %c1_i32 : i32
    %1 = arith.addi %0, %arg1 : i32
    %c0_i32 = arith.constant 0 : i32
    %2 = arith.minsi %1, %c0_i32 : i32
    %c0_i32_0 = arith.constant 0 : i32
    %c0_i32_1 = arith.constant 0 : i32
    return %2, %c0_i32_0 : i32, i32
  }
  func.func @transform_2(%arg0: i32, %arg1: i32) -> (i32, i32, i32) {
    %c0_i32 = arith.constant 0 : i32
    %c0_i32_0 = arith.constant 0 : i32
    %c0_i32_1 = arith.constant 0 : i32
    return %arg0, %c0_i32, %c0_i32_0 : i32, i32, i32
  }
}

</mosaic_0001>

<bundles_post_ra>
// kernel: tpu_custom_call.1
= control target key start
LH: loop header
LB: loop body
LE: loop exit
PB: predicated region body
PF: predicated region fallthrough
CT: control target
= control target key end

     0   :  { %7 = vsyncpa [#allocation3], 0  ;;  %s319_s0 = inlined_call_operand.hbm [shape: f32[2,16], index: 0, kind: input, shape index: {}]   ;;  %s320_s1 = inlined_call_operand.hbm [shape: f32[16,32], index: 1, kind: input, shape index: {}]   ;;  %s321_s2 = inlined_call_operand.hbm [shape: f32[1,2,32], index: 2, kind: output, shape index: {}]  }
   0x1   :  { %8 = vsyncpa [#allocation6], 0 }
   0x2   :  { %9 = vsyncpa [#allocation4], 0  ;;  %s251_s9 = smov [#allocation2]   ;;  %s252_s11 = smov [#allocation5]  }
   0x3   :  { %s19_s10 = sshll.u32 %s251_s9, 4  ;;  %s34_s12 = sshll.u32 %s252_s11, 4  ;;  %s20_s10 = int_to_ptr.vmem [resolvable:$true] %s19_s10  ;;  %s274_s12 = int_to_ptr.vmem [resolvable:$true] %s34_s12 }
   0x4   :  { %s179_s15 = scalar_lea.hbm %s319_s0, 32 }
   0x5   :  { %p180_p0 = scmp.ne.s32.totalorder %s319_s0, %s179_s15  ;;  %p183_p1 = scmp.lt.u32.totalorder %s179_s15, %s319_s0 }
   0x7   :  { %p185_p2 = pnand %p183_p1, %p180_p0 }
   0x9   :  { %188 = shalt.err (!%p185_p2)
}
   0xa   :  { %s189_s20 = scalar_lea.vmem %s20_s10, 32  ;;  %p194_p4 = scmp.lt.s32.totalorder %s20_s10, %s20_s10 }
   0xb   :  { %p190_p3 = scmp.ne.s32.totalorder %s20_s10, %s189_s20  ;;  %p195_p5 = scmp.lt.s32.totalorder %s189_s20, %s189_s20 }
   0xd   :  { %p196_p6 = por %p195_p5, %p194_p4 }
   0xf   :  { %p197_p7 = pnand %p196_p6, %p190_p3 }
  0x11   :  { %200 = shalt.err (!%p197_p7)
}
  0x12   :  { %22 = dma.hbm_to_vmem [thread:$0]  %s319_s0, 32, %s20_s10, [#allocation3]  }
  0x13   :  { %s201_s25 = scalar_lea.hbm %s320_s1, 256 }
  0x14   :  { %p202_p8 = scmp.ne.s32.totalorder %s320_s1, %s201_s25  ;;  %p205_p9 = scmp.lt.u32.totalorder %s201_s25, %s320_s1 }
  0x16   :  { %p207_p10 = pnand %p205_p9, %p202_p8 }
  0x18   :  { %210 = shalt.err (!%p207_p10)
}
  0x19   :  { %s211_s30 = scalar_lea.vmem %s274_s12, 256  ;;  %p216_p12 = scmp.lt.s32.totalorder %s274_s12, %s274_s12 }
  0x1a   :  { %p212_p11 = scmp.ne.s32.totalorder %s274_s12, %s211_s30  ;;  %p217_p13 = scmp.lt.s32.totalorder %s211_s30, %s211_s30 }
  0x1c   :  { %p218_p0 = por %p217_p13, %p216_p12 }
  0x1e   :  { %p219_p1 = pnand %p218_p0, %p212_p11 }
  0x20   :  { %222 = shalt.err (!%p219_p1)
}
  0x21   :  { %s253_s0 = smov 128   ;;  %s254_s3 = smov 8  }
  0x22   :  { %40 = dma.hbm_to_vmem [thread:$0]  %s320_s1, 256, %s274_s12, [#allocation6], %s253_s0, %s253_s0, %s254_s3  }
  0x23   :  { %245 = dma.done.wait [#allocation3], 32  }
  0x24   :  { %246 = vsyncadd [#allocation3], 4294967264 }
  0x25   :  { %247 = dma.done.wait [#allocation6], 256  }
  0x26   :  { %248 = vsyncadd [#allocation6], 4294967040  ;;  %vm56_vm0 = vcmask 254976   ;;  %v255_v0 = vmov 0.0|0.0   ;;  %v256_v1 = vmov 0.0   ;;  %vm257_vm1 = vmmov 0  }
  0x27   :  { %168 = vmatprep.subr.bf16.mxu0 %v255_v0  ;;  %57 = vst.msk [vmem:[#allocation7] sm:$0x3] %vm56_vm0, %v256_v1  ;;  %165 = vmatprep.mubr.msk.f32.mxu0 %vm257_vm1, %v256_v1  ;;  %v58_v2 = vld [vmem:[#allocation5] sm:$0xff]  ;;  %v59_v3 = vld [vmem:[#allocation5 + $0x8] sm:$0xff]  ;;  %v61_v5 = vld [vmem:[#allocation2] sm:$0x3] }
  0x28   :  { %v169_v4 = vpack.c.bf16 %v59_v3, %v58_v2  ;;  %vm62_vm2 = vcmask 130048   ;;  %s258_s1 = smov [#allocation7]  }
  0x29   :  { %s145_s6 = sshll.u32 %s258_s1, 4  ;;  %s146_s6 = int_to_ptr.vmem [resolvable:$true] %s145_s6 }
  0x2a   :  { %170 = vmatpush3.bf16.msra.mxu0 %v169_v4  ;;  %s223_s7 = scalar_lea.vmem %s146_s6, 32  ;;  %p228_p3 = scmp.lt.s32.totalorder %s146_s6, %s146_s6 }
  0x2b   :  { %p224_p2 = scmp.ne.s32.totalorder %s146_s6, %s223_s7  ;;  %p229_p4 = scmp.lt.s32.totalorder %s223_s7, %s223_s7 }
  0x2d   :  { %166 = vmatmul.mubr.msk.f32.vlgmr.msra.gmra.mrb[0].mxu0 %vm62_vm2, %v61_v5  ;;  %p230_p5 = por %p229_p4, %p228_p3 }
  0x2e   :  { %v60_v6 = vld [vmem:[#allocation7] sm:$0x3] }
  0x2f   :  { %p231_p6 = pnand %p230_p5, %p224_p2 }
 0x100   :  { %v132_v7 = vpop.f32.mrb[0].mxu0 }
 0x101   :  { %v136_v8 = vadd.f32 %v132_v7, %v60_v6  ;;  %v167_v9 = vpop.f32.mrb[1].mxu0 }
 0x103   :  { %138 = vst.msk [vmem:[#allocation7] sm:$0x3] %vm56_vm0, %v136_v8 }
 0x104   :  { %234 = shalt.err (!%p231_p6)
}
 0x105   :  { %s235_s10 = scalar_lea.hbm %s321_s2, 32 }
 0x106   :  { %p236_p7 = scmp.ne.s32.totalorder %s321_s2, %s235_s10  ;;  %p239_p8 = scmp.lt.u32.totalorder %s235_s10, %s321_s2 }
 0x108   :  { %p241_p9 = pnand %p239_p8, %p236_p7 }
 0x10a   :  { %244 = shalt.err (!%p241_p9)
}
 0x10b   :  { %148 = dma.vmem_to_hbm [thread:$0]  %s146_s6, 32, %s321_s2, [#allocation4]  }
 0x10c   :  { %249 = dma.done.wait [#allocation4], 32  }
 0x10d   :  { %250 = vsyncadd [#allocation4], 4294967264 }
 0x10e   :  { %152 = vsyncpa [#allocation3], 1 }
 0x10f   :  { %153 = vsyncpa [#allocation6], 1 }
 0x110   :  { %154 = vsyncpa [#allocation4], 1 }

</bundles_post_ra>
